<compile_context>
chip_gen: v6e
topology: v6e:2x2x1
jax: 0.10.0
libtpu: 0.0.40
codegen_flags: <defaults>
</compile_context>

<pallas_src>
import functools

import numpy as np
import jax
import jax.numpy as jnp
from jax.experimental import pallas as pl
from jax.experimental.pallas import tpu as pltpu


NUM_CLASSES = 3
HIDDEN = 128
BACKBONE_CH = (64, 128, 320, 512)     # x[0], x[1], x[2], x[3]
BACKBONE_STRIDE = (4, 8, 16, 32)


# ----------------------------------------------------------------------------
# Bilinear-interpolation matrices (PyTorch align_corners=False), host-cached.
# ----------------------------------------------------------------------------
@functools.lru_cache(maxsize=None)
def _interp_matrix(out_size, in_size):
    """Row-stochastic matrix replicating F.interpolate(bilinear, align_corners=False)."""
    if out_size == in_size:
        return np.eye(out_size, dtype=np.float32)
    scale = in_size / out_size
    m = np.zeros((out_size, in_size), dtype=np.float32)
    for i in range(out_size):
        src = max((i + 0.5) * scale - 0.5, 0.0)   # PyTorch clamps source index to >= 0
        i0 = min(int(np.floor(src)), in_size - 1)
        i1 = min(i0 + 1, in_size - 1)
        frac = src - i0
        m[i, i0] += 1.0 - frac
        m[i, i1] += frac
    return m


# ----------------------------------------------------------------------------
# Fused Pallas kernel: separable bilinear upsample with the folded channel
# projection absorbed into the height matrix.  One grid step per batch element.
#   stage A:  xw  = x2d (3h, w)  @ WwT (w, W)            -> (3h, W)
#   stage B:  out = kron(Wf, Wh) (3H, 3h) @ xw + bias    -> (3H, W)
# Everything f32; intermediates never leave VMEM.
# ----------------------------------------------------------------------------
def _fused_seg_kernel(x_ref, wwt_ref, whf_ref, bias_ref, o_ref):
    # Stage A: width upsample of the raw 3-channel stride-8 feature.
    xw = jnp.dot(x_ref[0], wwt_ref[...], preferred_element_type=jnp.float32)
    # Stage B: height upsample fused with the folded 3x3 channel projection,
    # plus the per-class bias column (bilinear rows sum to 1, so adding the bias
    # here is equivalent to PyTorch's add-before-interpolate).
    out = jnp.dot(whf_ref[...], xw, preferred_element_type=jnp.float32) + bias_ref[...]
    o_ref[0] = out.astype(o_ref.dtype)


# ----------------------------------------------------------------------------
# Parameters (deterministic init from the shapes implied by __init__)
# ----------------------------------------------------------------------------
def init_params(key):
    params = {}

    def nxt():
        nonlocal key
        key, sub = jax.random.split(key)
        return sub

    def w(shape, scale=0.02):
        return scale * jax.random.normal(nxt(), shape, dtype=jnp.float32)

    # synthetic backbone: stride-s 1x1 conv projections of the RGB input (all levels
    # are initialised for structural fidelity; only level 1 is live on this path)
    for i, c in enumerate(BACKBONE_CH):
        params[f"bb_w{i}"] = w((3, c))
        params[f"bb_b{i}"] = w((c,))
    # _bound_learner.convolution_mapping_{1,2,3}
    params["map1_w"] = w((128, HIDDEN)); params["map1_b"] = w((HIDDEN,))
    params["map2_w"] = w((320, HIDDEN)); params["map2_b"] = w((HIDDEN,))
    params["map3_w"] = w((512, HIDDEN)); params["map3_b"] = w((HIDDEN,))
    # _bound_learner.trans_out_conv (declared in __init__, unused in forward)
    params["trans_out_w"] = w((HIDDEN * 2, 512)); params["trans_out_b"] = w((512,))
    # synthetic classifier: 1x1 conv on the 128-channel level-1 feature
    params["cls_w"] = w((HIDDEN, NUM_CLASSES)); params["cls_b"] = w((NUM_CLASSES,))
    return params


def _padded_tile_bytes(rows, cols, itemsize=4):
    """VMEM footprint of a (rows, cols) f32 tile after (8, 128) padding."""
    return (-(-rows // 8) * 8) * (-(-cols // 128) * 128) * itemsize


# ----------------------------------------------------------------------------
# Forward pass (eval mode: self.training == False)
# ----------------------------------------------------------------------------
def simple_segmentation_model_forward(params, x):
    B, cin, H, W = x.shape
    s = BACKBONE_STRIDE[1]                      # level-1 backbone stride
    xs = x[:, :, ::s, ::s]                      # synthetic backbone spatial subsample
    h, w = xs.shape[-2], xs.shape[-1]
    x2d = xs.reshape(B, cin * h, w)             # free reshape (same NCHW memory layout)

    hi = jax.lax.Precision.HIGHEST

    # Fold the affine chain (backbone lvl-1 1x1 -> map1 -> classifier) on the host.
    a1 = params["bb_w1"].T                      # (HIDDEN, 3)
    a2 = params["map1_w"].T                     # (HIDDEN, HIDDEN)
    a3 = params["cls_w"].T                      # (NUM_CLASSES, HIDDEN)
    wf = jnp.dot(a3, jnp.dot(a2, a1, precision=hi), precision=hi)          # (3, 3)
    bf = (jnp.dot(a3, jnp.dot(a2, params["bb_b1"], precision=hi)
                  + params["map1_b"], precision=hi) + params["cls_b"])     # (3,)

    # Separable bilinear matrices (host-cached, f32 for parity with F.interpolate).
    wh = jnp.asarray(_interp_matrix(H, h))              # (H, h)
    wwt = jnp.asarray(_interp_matrix(W, w).T)           # (w, W)
    # Fuse the channel projection into the height matrix: kron(Wf, Wh) (3H, 3h).
    whf = jnp.kron(wf, wh)
    bias = jnp.repeat(bf, H).reshape(NUM_CLASSES * H, 1)

    ch = NUM_CLASSES * H
    block_bytes = (_padded_tile_bytes(cin * h, w) + _padded_tile_bytes(w, W)
                   + _padded_tile_bytes(ch, cin * h) + _padded_tile_bytes(ch, 1)
                   + _padded_tile_bytes(ch, W))
    vmem_limit = int(min(64 * 1024 * 1024, max(8 * 1024 * 1024, 4 * block_bytes)))

    out = pl.pallas_call(
        _fused_seg_kernel,
        out_shape=jax.ShapeDtypeStruct((B, ch, W), jnp.float32),
        grid=(B,),
        in_specs=[
            pl.BlockSpec((1, cin * h, w), lambda b: (b, 0, 0)),
            pl.BlockSpec((w, W), lambda b: (0, 0)),
            pl.BlockSpec((ch, cin * h), lambda b: (0, 0)),
            pl.BlockSpec((ch, 1), lambda b: (0, 0)),
        ],
        out_specs=pl.BlockSpec((1, ch, W), lambda b: (b, 0, 0)),
        compiler_params=pltpu.CompilerParams(
            dimension_semantics=("parallel",),
            vmem_limit_bytes=vmem_limit),
    )(x2d, wwt, whf, bias)

    # (B, 3*H, W) -> (B, 3, H, W) is a free reshape; no padded channels to slice away.
    outputs = out.reshape(B, NUM_CLASSES, H, W)
    point_pre1 = point_pre2 = point_pre3 = None
    return outputs, point_pre1, point_pre2, point_pre3


forward_jit = jax.jit(simple_segmentation_model_forward)


if __name__ == "__main__":
    key = jax.random.PRNGKey(0)
    pkey, xkey = jax.random.split(key)
    params = init_params(pkey)

    # small deterministic input, NCHW (64x64 so the level-1 stride-8 feature is 8x8)
    x = jax.random.normal(xkey, (2, 3, 64, 64), dtype=jnp.float32)

    outputs, p1, p2, p3 = forward_jit(params, x)
    jax.block_until_ready(outputs)

    assert outputs.shape == (2, NUM_CLASSES, 64, 64)
    assert outputs.dtype == jnp.float32
    assert p1 is None and p2 is None and p3 is None

    # Pure-JAX reference of the live path (unfused f32 chain + bilinear upsample).
    hi = jax.lax.Precision.HIGHEST
    s = BACKBONE_STRIDE[1]
    xs = x[:, :, ::s, ::s]
    f1 = jnp.einsum('oc,bchw->bohw', params["bb_w1"].T, xs, precision=hi) \
        + params["bb_b1"][None, :, None, None]
    f1 = jnp.einsum('oc,bchw->bohw', params["map1_w"].T, f1, precision=hi) \
        + params["map1_b"][None, :, None, None]
    lg = jnp.einsum('oc,bchw->bohw', params["cls_w"].T, f1, precision=hi) \
        + params["cls_b"][None, :, None, None]
    wh = jnp.asarray(_interp_matrix(64, lg.shape[-2]))
    wwt = jnp.asarray(_interp_matrix(64, lg.shape[-1]).T)
    ref = jnp.einsum('Yy,bcyx,xX->bcYX', wh, lg, wwt, precision=hi)
    err = float(jnp.max(jnp.abs(outputs - ref)))
    assert err < 2e-3, f"max abs err vs reference: {err}"

    print("KERNEL_OK")
</pallas_src>

<mosaic_0001>
module attributes {stable_mosaic.version = 11 : i64} {
  func.func @_fused_seg_kernel(%arg0: i32, %arg1: memref<1x24x8xf32, #tpu.memory_space<vmem>>, %arg2: memref<8x64xf32, #tpu.memory_space<vmem>>, %arg3: memref<192x24xf32, #tpu.memory_space<vmem>>, %arg4: memref<192x1xf32, #tpu.memory_space<vmem>>, %arg5: memref<1x192x64xf32, #tpu.memory_space<vmem>>) attributes {dimension_semantics = [#tpu.dimension_semantics<parallel>], iteration_bounds = array<i64: 2>, scalar_prefetch = 0 : i64, scratch_operands = 0 : i64, tpu.core_type = #tpu.core_type<tc>, window_params = [{transform_indices = @transform_0, window_bounds = array<i64: 1, 24, 8>}, {pipeline_mode = #tpu.pipeline_mode<synchronous>, transform_indices = @transform_1, window_bounds = array<i64: 8, 64>}, {pipeline_mode = #tpu.pipeline_mode<synchronous>, transform_indices = @transform_2, window_bounds = array<i64: 192, 24>}, {pipeline_mode = #tpu.pipeline_mode<synchronous>, transform_indices = @transform_3, window_bounds = array<i64: 192, 1>}, {transform_indices = @transform_4, window_bounds = array<i64: 1, 192, 64>}]} {
    %c0 = arith.constant 0 : index
    %c0_0 = arith.constant 0 : index
    %c0_1 = arith.constant 0 : index
    %0 = vector.load %arg1[%c0, %c0_0, %c0_1] : memref<1x24x8xf32, #tpu.memory_space<vmem>>, vector<1x24x8xf32>
    %1 = vector.shape_cast %0 : vector<1x24x8xf32> to vector<24x8xf32>
    %c0_2 = arith.constant 0 : index
    %c0_3 = arith.constant 0 : index
    %2 = vector.load %arg2[%c0_2, %c0_3] : memref<8x64xf32, #tpu.memory_space<vmem>>, vector<8x64xf32>
    %cst = arith.constant dense<0.000000e+00> : vector<24x64xf32>
    %3 = tpu.matmul %1, %2, %cst {dimension_numbers = #tpu.dot_dimension_numbers<[1], [0], [0], [1], [0, 0, 1, 1], [], []>} : vector<24x8xf32>, vector<8x64xf32>, vector<24x64xf32> -> vector<24x64xf32>
    %c0_4 = arith.constant 0 : index
    %c0_5 = arith.constant 0 : index
    %4 = vector.load %arg3[%c0_4, %c0_5] : memref<192x24xf32, #tpu.memory_space<vmem>>, vector<192x24xf32>
    %cst_6 = arith.constant dense<0.000000e+00> : vector<192x64xf32>
    %5 = tpu.matmul %4, %3, %cst_6 {dimension_numbers = #tpu.dot_dimension_numbers<[1], [0], [0], [1], [0, 0, 1, 1], [], []>} : vector<192x24xf32>, vector<24x64xf32>, vector<192x64xf32> -> vector<192x64xf32>
    %c0_7 = arith.constant 0 : index
    %c0_8 = arith.constant 0 : index
    %6 = vector.load %arg4[%c0_7, %c0_8] : memref<192x1xf32, #tpu.memory_space<vmem>>, vector<192x1xf32>
    %7 = vector.broadcast %6 : vector<192x1xf32> to vector<192x64xf32>
    %8 = arith.addf %5, %7 : vector<192x64xf32>
    %c0_9 = arith.constant 0 : index
    %c0_10 = arith.constant 0 : index
    %c0_11 = arith.constant 0 : index
    %9 = vector.load %arg5[%c0_9, %c0_10, %c0_11] : memref<1x192x64xf32, #tpu.memory_space<vmem>>, vector<1x192x64xf32>
    %10 = vector.shape_cast %9 : vector<1x192x64xf32> to vector<192x64xf32>
    %11 = vector.shape_cast %8 : vector<192x64xf32> to vector<1x192x64xf32>
    tpu.vector_store %arg5[%c0_9, %c0_10, %c0_11], %11 {strides = array<i32>} : memref<1x192x64xf32, #tpu.memory_space<vmem>>, vector<1x192x64xf32>,
    return
  }
  func.func @transform_0(%arg0: i32) -> (i32, i32, i32) {
    %c0_i32 = arith.constant 0 : i32
    %c0_i32_0 = arith.constant 0 : i32
    %c0_i32_1 = arith.constant 0 : i32
    return %arg0, %c0_i32, %c0_i32_0 : i32, i32, i32
  }
  func.func @transform_1(%arg0: i32) -> (i32, i32) {
    %c0_i32 = arith.constant 0 : i32
    %c0_i32_0 = arith.constant 0 : i32
    %c0_i32_1 = arith.constant 0 : i32
    return %c0_i32, %c0_i32_0 : i32, i32
  }
  func.func @transform_2(%arg0: i32) -> (i32, i32) {
    %c0_i32 = arith.constant 0 : i32
    %c0_i32_0 = arith.constant 0 : i32
    %c0_i32_1 = arith.constant 0 : i32
    return %c0_i32, %c0_i32_0 : i32, i32
  }
  func.func @transform_3(%arg0: i32) -> (i32, i32) {
    %c0_i32 = arith.constant 0 : i32
    %c0_i32_0 = arith.constant 0 : i32
    %c0_i32_1 = arith.constant 0 : i32
    return %c0_i32, %c0_i32_0 : i32, i32
  }
  func.func @transform_4(%arg0: i32) -> (i32, i32, i32) {
    %c0_i32 = arith.constant 0 : i32
    %c0_i32_0 = arith.constant 0 : i32
    %c0_i32_1 = arith.constant 0 : i32
    return %arg0, %c0_i32, %c0_i32_0 : i32, i32, i32
  }
}

</mosaic_0001>

<bundles_post_ra>
// kernel: simple_segmentation_model_forward.1
= control target key start
LH: loop header
LB: loop body
LE: loop exit
PB: predicated region body
PF: predicated region fallthrough
CT: control target
= control target key end

     0   :  { %9 = vsyncpa [#allocation3], 0  ;;  %s1418_s0 = inlined_call_operand.vmem [shape: f32[2,24,8], index: 0, kind: input, shape index: {}]   ;;  %s1419_s1 = inlined_call_operand.vmem [shape: f32[8,64], index: 1, kind: input, shape index: {}]   ;;  %s1420_s2 = inlined_call_operand.vmem [shape: f32[192,24], index: 2, kind: input, shape index: {}]   ;;  %s1421_s3 = inlined_call_operand.vmem [shape: f32[192,1], index: 3, kind: input, shape index: {}]   ;;  %s1422_s4 = inlined_call_operand.hbm [shape: f32[2,192,64], index: 4, kind: output, shape index: {}]  }
   0x1   :  { %11 = vsyncpa [#allocation3 + $0x1], 0  ;;  %s1084_s15 = smov 0   ;;  %s1086_s16 = smov 0  }
   0x2   :  { %s1088_s17 = smov 0   ;;  %s1090_s18 = smov 0  }
   0x3 LB: > { %s1105_s19 = sadd.s32 4294967295, %s1051_s18   ;;  %s817_s20 = sadd.s32 4294967294, %s1051_s18   ;;  %s1051_s18 = sphi %s1090_s18, %s1428_s18   ;;  %s1047_s17 = sphi %s1088_s17, %s1427_s17   ;;  %s1043_s16 = sphi %s1086_s16, %s1426_s16   ;;  %s1039_s15 = sphi %s1084_s15, %s1425_s15  }
   0x4   : > { %s1109_s21 = sadd.s32 1, %s1051_s18   ;;  %s113_s22 = sadd.s32 1, %s1047_s17 }
   0x5   : > { %s110_s23 = ssub.s32 %s1051_s18, %s1109_s21  ;;  %p123_p0 = scmp.ne.s32.totalorder %s1047_s17, %s1043_s16 }
   0x6   : > { %p111_p1 = scmp.eq.s32.totalorder %s110_s23, 0  ;;  %p124_p2 = scmp.eq.s32.totalorder %s1105_s19, 1 }
   0x7   : > { %p129_p3 = scmp.ne.s32.totalorder %s1043_s16, %s1039_s15  ;;  %p130_p4 = scmp.eq.s32.totalorder %s817_s20, 1 }
   0x8   : > { %s1120_s24 = scalar_select %p111_p1, %s1047_s17, %s113_s22  }
   0x9   : > { %p1122_p5 = por %p124_p2, %p123_p0  ;;  %p1126_p6 = por %p130_p4, %p129_p3 }
   0xa   : > { %p820_p7 = scmp.ge.s32.totalorder %s1051_s18, 1  ;;  %p165_p8 = scmp.lt.s32.totalorder %s1051_s18, 3 }
   0xc   : > { %p166_p9 = pnand %p820_p7, %p165_p8 }
   0xd   : > { %p191_p10 = scmp.lt.s32.totalorder (!%p166_p9), %s1105_s19, 1  ;;  %s188_s28 = sand.u32 (!%p166_p9), 1, %s1043_s16  }
   0xe   : > { %169 = sbr.rel (%p166_p9) target bundleno = 467 (0x1d3), region = 36  ;;  %s1056_s11 = smov (!%p166_p9), [#allocation2]  }
   0xf   : > { %s944_s5 = smul.u32 (!%p166_p9), 3072, %s1105_s19  ;;  %s995_s12 = sshll.u32 (!%p166_p9), %s1056_s11, 4  ;;  %s996_s12 = int_to_ptr.vmem [resolvable:$false] %s995_s12 }
  0x10   : > { %s997_s13 = scalar_lea.vmem (!%p166_p9), %s996_s12, 6144 }
  0x11   : > { %s1368_s9 = scalar_lea.hbm (!%p166_p9), %s1422_s4, %s944_s5 }
  0x13   : > { %v199_v0 = vld [vmem:[%s1419_s1] sm:$0xff]  ;;  %v1053_v1 = vmov 0.0   ;;  %vm1054_vm0 = vmmov 0   ;;  %s192_s29 = scalar_select %p191_p10, %s1105_s19, 1  ;;  %vm200_vm1 = vcmask 64512   ;;  %vm458_vm2 = vcmask 195584  }
  0x14   : > { %883 = vmatprep.subr.mxu0 %v1053_v1  ;;  %885 = vmatprep.mubr.msk.f32.mxu0 %vm1054_vm0, %v1053_v1  ;;  %v290_v5 = vld [vmem:[%s1420_s2] sm:$0xff]  ;;  %v300_v6 = vld [vmem:[%s1420_s2 + $0x50] sm:$0xff]  ;;  %v1055_v9 = vmov 0   ;;  %v317_v10 = vld [vmem:[%s1421_s3 + $0x18] sm:$0xff]  ;;  %vm716_vm3 = vcmask 523264   ;;  %s1378_s19 = scalar_lea.sflag [#allocation3], %s188_s28 }
  0x15   : > { %884 = vmatpush3.msra.mxu0 %v199_v0  ;;  %s943_s30 = smul.u32 24, %s192_s29  ;;  %915 = vmatprep.mubr.msk.f32.mxu1 %vm458_vm2, %v300_v6  ;;  %v316_v7 = vld [vmem:[%s1421_s3 + $0x10] sm:$0xff]  ;;  %v314_v8 = vld [vmem:[%s1421_s3] sm:$0xff]  ;;  %v315_v11 = vld [vmem:[%s1421_s3 + $0x8] sm:$0xff] }
  0x16   : > { %990 = vset.pattern.permute.xlu1 %v1055_v9  ;;  %989 = vset.pattern.permute.xlu0 %v1055_v9  ;;  %v319_v12 = vld [vmem:[%s1421_s3 + $0x28] sm:$0xff]  ;;  %v318_v13 = vld [vmem:[%s1421_s3 + $0x20] sm:$0xff]  ;;  %v321_v14 = vld [vmem:[%s1421_s3 + $0x38] sm:$0xff]  ;;  %s942_s29 = smul.u32 192, %s188_s28 }
  0x17   : > { %s195_s7 = scalar_lea.vmem %s1418_s0, %s943_s30  ;;  %350 = vperm.xlu1 %990, %v316_v7   ;;  %340 = vperm.xlu0 %989, %v314_v8   ;;  %v320_v15 = vld [vmem:[%s1421_s3 + $0x30] sm:$0xff]  ;;  %v323_v16 = vld [vmem:[%s1421_s3 + $0x48] sm:$0xff]  ;;  %v322_v17 = vld [vmem:[%s1421_s3 + $0x40] sm:$0xff] }
  0x18   : > { %v196_v2 = vld [vmem:[%s195_s7] sm:$0xff]  ;;  %v197_v3 = vld [vmem:[%s195_s7 + $0x8] sm:$0xff]  ;;  %v198_v4 = vld [vmem:[%s195_s7 + $0x10] sm:$0xff]  ;;  %s1315_s30 = scalar_lea.vmem [#allocation2], %s942_s29 }
  0x19   : > { %886 = vmatmul.mubr.msk.f32.vlgmr.msra.gmra.mxu0 %vm200_vm1, %v196_v2  ;;  %v325_v18 = vld [vmem:[%s1421_s3 + $0x58] sm:$0xff]  ;;  %v324_v19 = vld [vmem:[%s1421_s3 + $0x50] sm:$0xff]  ;;  %v327_v20 = vld [vmem:[%s1421_s3 + $0x68] sm:$0xff]  ;;  %s755_s6 = sshll.u32 %s1315_s30, 4  ;;  %s1370_s6 = int_to_ptr.vmem [resolvable:$true] %s755_s6 }
  0x1a   : > { %888 = vmatprep.mubr.msk.f32.mxu0 %vm1054_vm0, %v1053_v1  ;;  %v326_v21 = vld [vmem:[%s1421_s3 + $0x60] sm:$0xff]  ;;  %v329_v22 = vld [vmem:[%s1421_s3 + $0x78] sm:$0xff]  ;;  %v328_v23 = vld [vmem:[%s1421_s3 + $0x70] sm:$0xff]  ;;  %s991_s10 = scalar_lea.vmem %s1370_s6, 3072  ;;  %p998_p0 = scmp.lt.s32.totalorder %s1370_s6, %s996_s12 }
  0x1b   : > { %355 = vperm.xlu1 %990, %v317_v10   ;;  %345 = vperm.xlu0 %989, %v315_v11   ;;  %v331_v24 = vld [vmem:[%s1421_s3 + $0x88] sm:$0xff]  ;;  %v330_v25 = vld [vmem:[%s1421_s3 + $0x80] sm:$0xff]  ;;  %v333_v26 = vld [vmem:[%s1421_s3 + $0x98] sm:$0xff]  ;;  %p992_p11 = scmp.ne.s32.totalorder %s1370_s6, %s991_s10  ;;  %p999_p1 = scmp.lt.s32.totalorder %s997_s13, %s991_s10 }
  0x1c   : > { %v332_v27 = vld [vmem:[%s1421_s3 + $0x90] sm:$0xff]  ;;  %v335_v28 = vld [vmem:[%s1421_s3 + $0xa8] sm:$0xff]  ;;  %v334_v29 = vld [vmem:[%s1421_s3 + $0xa0] sm:$0xff] }
  0x1d   : > { %889 = vmatmul.mubr.msk.f32.gmra.mxu0 %vm200_vm1, %v197_v3  ;;  %v337_v30 = vld [vmem:[%s1421_s3 + $0xb8] sm:$0xff]  ;;  %v336_v31 = vld [vmem:[%s1421_s3 + $0xb0] sm:$0xff]  ;;  %v291_v38 = vld [vmem:[%s1420_s2 + $0x8] sm:$0xff]  ;;  %p993_p12 = pnand %p992_p11, %p1122_p5  ;;  %p1000_p2 = por %p999_p1, %p998_p0 }
  0x1e   : > { %891 = vmatprep.mubr.msk.f32.mxu0 %vm1054_vm0, %v1053_v1  ;;  %v301_v39 = vld [vmem:[%s1420_s2 + $0x58] sm:$0xff]  ;;  %v292_v40 = vld [vmem:[%s1420_s2 + $0x10] sm:$0xff]  ;;  %v302_v41 = vld [vmem:[%s1420_s2 + $0x60] sm:$0xff] }
  0x1f   : > { %365 = vperm.xlu1 %990, %v319_v12   ;;  %360 = vperm.xlu0 %989, %v318_v13   ;;  %v293_v42 = vld [vmem:[%s1420_s2 + $0x18] sm:$0xff]  ;;  %v303_v43 = vld [vmem:[%s1420_s2 + $0x68] sm:$0xff]  ;;  %v294_v44 = vld [vmem:[%s1420_s2 + $0x20] sm:$0xff]  ;;  %p994_p13 = pneg %p993_p12 }
  0x20   : > { %v304_v45 = vld [vmem:[%s1420_s2 + $0x70] sm:$0xff]  ;;  %v295_v46 = vld [vmem:[%s1420_s2 + $0x28] sm:$0xff]  ;;  %v305_v47 = vld [vmem:[%s1420_s2 + $0x78] sm:$0xff] }
  0x21   : > { %892 = vmatmul.mubr.msk.f32.gmra.mxu0 %vm200_vm1, %v198_v4  ;;  %v296_v48 = vld [vmem:[%s1420_s2 + $0x30] sm:$0xff]  ;;  %v306_v49 = vld [vmem:[%s1420_s2 + $0x80] sm:$0xff]  ;;  %v297_v50 = vld [vmem:[%s1420_s2 + $0x38] sm:$0xff]  ;;  %p1001_p3 = pnand %p1000_p2, %p994_p13 }
  0x22   : > { %900 = vmatprep.mubr.msk.f32.mxu0 %vm458_vm2, %v290_v5  ;;  %v307_v51 = vld [vmem:[%s1420_s2 + $0x88] sm:$0xff]  ;;  %v298_v52 = vld [vmem:[%s1420_s2 + $0x40] sm:$0xff]  ;;  %v308_v53 = vld [vmem:[%s1420_s2 + $0x90] sm:$0xff] }
  0x23   : > { %375 = vperm.xlu1 %990, %v321_v14   ;;  %370 = vperm.xlu0 %989, %v320_v15   ;;  %v299_v54 = vld [vmem:[%s1420_s2 + $0x48] sm:$0xff]  ;;  %v309_v55 = vld [vmem:[%s1420_s2 + $0x98] sm:$0xff]  ;;  %v310_v56 = vld [vmem:[%s1420_s2 + $0xa0] sm:$0xff] }
  0x24   : > { %v311_v57 = vld [vmem:[%s1420_s2 + $0xa8] sm:$0xff]  ;;  %v312_v58 = vld [vmem:[%s1420_s2 + $0xb0] sm:$0xff]  ;;  %v313_v59 = vld [vmem:[%s1420_s2 + $0xb8] sm:$0xff] }
  0x27   : > { %385 = vperm.xlu1 %990, %v323_v16   ;;  %380 = vperm.xlu0 %989, %v322_v17  }
  0x2b   : > { %395 = vperm.xlu1 %990, %v325_v18   ;;  %390 = vperm.xlu0 %989, %v324_v19  }
  0x2f   : > { %405 = vperm.xlu1 %990, %v327_v20   ;;  %400 = vperm.xlu0 %989, %v326_v21  }
  0x33   : > { %415 = vperm.xlu1 %990, %v329_v22   ;;  %410 = vperm.xlu0 %989, %v328_v23  }
  0x37   : > { %425 = vperm.xlu1 %990, %v331_v24   ;;  %420 = vperm.xlu0 %989, %v330_v25  }
  0x3b   : > { %435 = vperm.xlu1 %990, %v333_v26   ;;  %430 = vperm.xlu0 %989, %v332_v27  }
  0x3f   : > { %445 = vperm.xlu1 %990, %v335_v28   ;;  %440 = vperm.xlu0 %989, %v334_v29  }
  0x43   : > { %455 = vperm.xlu1 %990, %v337_v30   ;;  %450 = vperm.xlu0 %989, %v336_v31  }
  0x92   : > { %v351_v60 = vpop.permute.xlu1 %350  ;;  %v341_v61 = vpop.permute.xlu0 %340 }
  0x96   : > { %v356_v62 = vpop.permute.xlu1 %355  ;;  %v346_v63 = vpop.permute.xlu0 %345 }
  0x9a   : > { %v366_v0 = vpop.permute.xlu1 %365  ;;  %v361_v1 = vpop.permute.xlu0 %360 }
  0x9e   : > { %v376_v2 = vpop.permute.xlu1 %375  ;;  %v371_v3 = vpop.permute.xlu0 %370 }
  0xa2   : > { %v1308_v4 = vpop.permute.xlu1 %385  ;;  %v1310_v5 = vpop.permute.xlu0 %380 }
  0xa6   : > { %v396_v6 = vpop.permute.xlu1 %395  ;;  %v391_v7 = vpop.permute.xlu0 %390 }
  0xaa   : > { %v406_v8 = vpop.permute.xlu1 %405  ;;  %v401_v9 = vpop.permute.xlu0 %400 }
  0xae   : > { %v416_v10 = vpop.permute.xlu1 %415  ;;  %v411_v13 = vpop.permute.xlu0 %410 }
  0xb2   : > { %v426_v22 = vpop.permute.xlu1 %425  ;;  %v421_v27 = vpop.permute.xlu0 %420 }
  0xd9   : > { %v276_v32 = vpop.f32.mrf.mxu0 }
  0xdb   : > { %v887_v33 = vpop.f32.mrf.mxu0 }
  0xdd   : > { %v281_v34 = vpop.f32.mrf.mxu0 }
  0xdf   : > { %v890_v35 = vpop.f32.mrf.mxu0 }
  0xe1   : > { %v286_v36 = vpop.f32.mrf.mxu0 }
  0xe2   : > { %894 = vmatprep.subr.mxu0 %v286_v36  ;;  %936 = vmatprep.subr.mxu1 %v286_v36 }
  0xe3   : > { %v893_v37 = vpop.f32.mrf.mxu0  ;;  %895 = vmatpush3.msra.mxu0 %v286_v36  ;;  %939 = vmatpush3.msra.mxu1 %v286_v36  ;;  %v436_v36 = vpop.permute.xlu1 %435 }
  0xe4   : > { %896 = vmatprep.subr.mxu0 %v281_v34  ;;  %937 = vmatprep.subr.mxu1 %v281_v34 }
  0xe5   : > { %897 = vmatpush3.msra.mxu0 %v281_v34  ;;  %940 = vmatpush3.msra.mxu1 %v281_v34 }
  0xe6   : > { %898 = vmatprep.subr.mxu0 %v276_v32  ;;  %938 = vmatprep.subr.mxu1 %v276_v32 }
  0xe7   : > { %899 = vmatpush3.msra.mxu0 %v276_v32  ;;  %941 = vmatpush3.msra.mxu1 %v276_v32 }
  0xe8   : > { %901 = vmatmul.mubr.msk.f32.vlgmr.msra.gmra.mxu0 %vm458_vm2, %v291_v38  ;;  %916 = vmatmul.mubr.msk.f32.vlgmr.msra.gmra.mxu1 %vm458_vm2, %v301_v39 }
  0xe9   : > { %903 = vmatprep.mubr.msk.f32.mxu0 %vm458_vm2, %v292_v40  ;;  %918 = vmatprep.mubr.msk.f32.mxu1 %vm458_vm2, %v302_v41  ;;  %v431_v41 = vpop.permute.xlu0 %430 }
  0xec   : > { %904 = vmatmul.mubr.msk.f32.gmra.mxu0 %vm458_vm2, %v293_v42  ;;  %919 = vmatmul.mubr.msk.f32.gmra.mxu1 %vm458_vm2, %v303_v43 }
  0xed   : > { %906 = vmatprep.mubr.msk.f32.mxu0 %vm458_vm2, %v294_v44  ;;  %921 = vmatprep.mubr.msk.f32.mxu1 %vm458_vm2, %v304_v45 }
  0xf0   : > { %907 = vmatmul.mubr.msk.f32.gmra.mxu0 %vm458_vm2, %v295_v46  ;;  %922 = vmatmul.mubr.msk.f32.gmra.mxu1 %vm458_vm2, %v305_v47 }
  0xf1   : > { %909 = vmatprep.mubr.msk.f32.mxu0 %vm458_vm2, %v296_v48  ;;  %924 = vmatprep.mubr.msk.f32.mxu1 %vm458_vm2, %v306_v49 }
  0xf4   : > { %910 = vmatmul.mubr.msk.f32.gmra.mxu0 %vm458_vm2, %v297_v50  ;;  %925 = vmatmul.mubr.msk.f32.gmra.mxu1 %vm458_vm2, %v307_v51  ;;  %v446_v50 = vpop.permute.xlu1 %445 }
  0xf5   : > { %912 = vmatprep.mubr.msk.f32.mxu0 %vm458_vm2, %v298_v52  ;;  %927 = vmatprep.mubr.msk.f32.mxu1 %vm458_vm2, %v308_v53 }
  0xf8   : > { %913 = vmatmul.mubr.msk.f32.gmra.mxu0 %vm458_vm2, %v299_v54  ;;  %928 = vmatmul.mubr.msk.f32.gmra.mxu1 %vm458_vm2, %v309_v55 }
  0xf9   : > { %930 = vmatprep.mubr.msk.f32.mxu1 %vm458_vm2, %v310_v56 }
  0xfc   : > { %931 = vmatmul.mubr.msk.f32.gmra.mxu1 %vm458_vm2, %v311_v57  ;;  %v441_v57 = vpop.permute.xlu0 %440 }
  0xfd   : > { %933 = vmatprep.mubr.msk.f32.mxu1 %vm458_vm2, %v312_v58 }
 0x100   : > { %934 = vmatmul.mubr.msk.f32.gmra.mxu1 %vm458_vm2, %v313_v59 }
 0x1a8   : > { %v902_v11 = vpop.f32.mrf.mxu0  ;;  %v917_v12 = vpop.f32.mrf.mxu1 }
 0x1a9   : > { %v603_v14 = vadd.f32 %v902_v11, %v346_v63  ;;  %v653_v15 = vadd.f32 %v917_v12, %v396_v6 }
 0x1aa   : > { %v597_v16 = vpop.f32.mrf.mxu0  ;;  %v647_v17 = vpop.f32.mrf.mxu1 }
 0x1ab   : > { %718 = vst.msk [vmem:[%s1315_s30 + $0x8] sm:$0xff] %vm716_vm3, %v603_v14  ;;  %728 = vst.msk [vmem:[%s1315_s30 + $0x58] sm:$0xff] %vm716_vm3, %v653_v15  ;;  %v598_v18 = vadd.f32 %v597_v16, %v341_v61  ;;  %v648_v19 = vadd.f32 %v647_v17, %v391_v7 }
 0x1ac   : > { %v905_v20 = vpop.f32.mrf.mxu0  ;;  %v920_v21 = vpop.f32.mrf.mxu1 }
 0x1ad   : > { %717 = vst.msk [vmem:[%s1315_s30] sm:$0xff] %vm716_vm3, %v598_v18  ;;  %727 = vst.msk [vmem:[%s1315_s30 + $0x50] sm:$0xff] %vm716_vm3, %v648_v19  ;;  %v613_v23 = vadd.f32 %v905_v20, %v356_v62  ;;  %v663_v24 = vadd.f32 %v920_v21, %v406_v8  ;;  %v456_v62 = vpop.permute.xlu1 %455 }
 0x1ae   : > { %v607_v25 = vpop.f32.mrf.mxu0  ;;  %v657_v26 = vpop.f32.mrf.mxu1 }
 0x1af   : > { %720 = vst.msk [vmem:[%s1315_s30 + $0x18] sm:$0xff] %vm716_vm3, %v613_v23  ;;  %730 = vst.msk [vmem:[%s1315_s30 + $0x68] sm:$0xff] %vm716_vm3, %v663_v24  ;;  %v608_v28 = vadd.f32 %v607_v25, %v351_v60  ;;  %v658_v29 = vadd.f32 %v657_v26, %v401_v9 }
 0x1b0   : > { %v908_v30 = vpop.f32.mrf.mxu0  ;;  %v923_v31 = vpop.f32.mrf.mxu1 }
 0x1b1   : > { %719 = vst.msk [vmem:[%s1315_s30 + $0x10] sm:$0xff] %vm716_vm3, %v608_v28  ;;  %729 = vst.msk [vmem:[%s1315_s30 + $0x60] sm:$0xff] %vm716_vm3, %v658_v29  ;;  %v623_v32 = vadd.f32 %v908_v30, %v366_v0  ;;  %v673_v33 = vadd.f32 %v923_v31, %v416_v10 }
 0x1b2   : > { %v617_v34 = vpop.f32.mrf.mxu0  ;;  %v667_v35 = vpop.f32.mrf.mxu1 }
 0x1b3   : > { %722 = vst.msk [vmem:[%s1315_s30 + $0x28] sm:$0xff] %vm716_vm3, %v623_v32  ;;  %732 = vst.msk [vmem:[%s1315_s30 + $0x78] sm:$0xff] %vm716_vm3, %v673_v33  ;;  %v618_v37 = vadd.f32 %v617_v34, %v361_v1  ;;  %v668_v38 = vadd.f32 %v667_v35, %v411_v13  ;;  %v451_v1 = vpop.permute.xlu0 %450 }
 0x1b4   : > { %v911_v39 = vpop.f32.mrf.mxu0  ;;  %v926_v40 = vpop.f32.mrf.mxu1 }
 0x1b5   : > { %721 = vst.msk [vmem:[%s1315_s30 + $0x20] sm:$0xff] %vm716_vm3, %v618_v37  ;;  %731 = vst.msk [vmem:[%s1315_s30 + $0x70] sm:$0xff] %vm716_vm3, %v668_v38  ;;  %v633_v42 = vadd.f32 %v911_v39, %v376_v2  ;;  %v683_v43 = vadd.f32 %v926_v40, %v426_v22 }
 0x1b6   : > { %v627_v44 = vpop.f32.mrf.mxu0  ;;  %v677_v45 = vpop.f32.mrf.mxu1 }
 0x1b7   : > { %724 = vst.msk [vmem:[%s1315_s30 + $0x38] sm:$0xff] %vm716_vm3, %v633_v42  ;;  %734 = vst.msk [vmem:[%s1315_s30 + $0x88] sm:$0xff] %vm716_vm3, %v683_v43  ;;  %v628_v46 = vadd.f32 %v627_v44, %v371_v3  ;;  %v678_v47 = vadd.f32 %v677_v45, %v421_v27 }
 0x1b8   : > { %v914_v48 = vpop.f32.mrf.mxu0  ;;  %v929_v49 = vpop.f32.mrf.mxu1 }
 0x1b9   : > { %723 = vst.msk [vmem:[%s1315_s30 + $0x30] sm:$0xff] %vm716_vm3, %v628_v46  ;;  %733 = vst.msk [vmem:[%s1315_s30 + $0x80] sm:$0xff] %vm716_vm3, %v678_v47  ;;  %v643_v51 = vadd.f32 %v914_v48, %v1308_v4  ;;  %v693_v52 = vadd.f32 %v929_v49, %v436_v36 }
 0x1ba   : > { %v637_v53 = vpop.f32.mrf.mxu0  ;;  %v687_v54 = vpop.f32.mrf.mxu1 }
 0x1bb   : > { %726 = vst.msk [vmem:[%s1315_s30 + $0x48] sm:$0xff] %vm716_vm3, %v643_v51  ;;  %736 = vst.msk [vmem:[%s1315_s30 + $0x98] sm:$0xff] %vm716_vm3, %v693_v52  ;;  %v638_v55 = vadd.f32 %v637_v53, %v1310_v5  ;;  %v688_v56 = vadd.f32 %v687_v54, %v431_v41 }
 0x1bc   : > { %v932_v58 = vpop.f32.mrf.mxu1 }
 0x1bd   : > { %725 = vst.msk [vmem:[%s1315_s30 + $0x40] sm:$0xff] %vm716_vm3, %v638_v55  ;;  %735 = vst.msk [vmem:[%s1315_s30 + $0x90] sm:$0xff] %vm716_vm3, %v688_v56  ;;  %v703_v59 = vadd.f32 %v932_v58, %v446_v50 }
 0x1be   : > { %v697_v60 = vpop.f32.mrf.mxu1 }
 0x1bf   : > { %738 = vst.msk [vmem:[%s1315_s30 + $0xa8] sm:$0xff] %vm716_vm3, %v703_v59  ;;  %v698_v61 = vadd.f32 %v697_v60, %v441_v57 }
 0x1c0   : > { %v935_v63 = vpop.f32.mrf.mxu1 }
 0x1c1   : > { %737 = vst.msk [vmem:[%s1315_s30 + $0xa0] sm:$0xff] %vm716_vm3, %v698_v61  ;;  %v713_v0 = vadd.f32 %v935_v63, %v456_v62 }
 0x1c2   : > { %v707_v2 = vpop.f32.mrf.mxu1 }
 0x1c3   : > { %740 = vst.msk [vmem:[%s1315_s30 + $0xb8] sm:$0xff] %vm716_vm3, %v713_v0  ;;  %v708_v3 = vadd.f32 %v707_v2, %v451_v1 }
 0x1c5   : > { %739 = vst.msk [vmem:[%s1315_s30 + $0xb0] sm:$0xff] %vm716_vm3, %v708_v3 }
 0x1c6   : > { %1004 = shalt.err (!%p1001_p3)
}
 0x1c7   : > { %s1005_s14 = scalar_lea.hbm %s1368_s9, 3072  ;;  %s1009_s23 = scalar_lea.hbm %s1422_s4, 6144 }
 0x1c8   : > { %p1006_p4 = scmp.ne.s32.totalorder %s1368_s9, %s1005_s14  ;;  %p1010_p9 = scmp.lt.s32.totalorder %s1368_s9, %s1422_s4 }
 0x1c9   : > { %p1011_p10 = scmp.lt.s32.totalorder %s1009_s23, %s1005_s14 }
 0x1ca   : > { %p1007_p7 = pnand %p1006_p4, %p1122_p5 }
 0x1cb   : > { %p1012_p11 = por %p1011_p10, %p1010_p9 }
 0x1cc   : > { %p1008_p8 = pneg %p1007_p7 }
 0x1ce   : > { %p1013_p12 = pnand %p1012_p11, %p1008_p8 }
 0x1d0   : > { %1016 = shalt.err (!%p1013_p12)
}
 0x1d1   : > { %s1057_s29 = smov 128   ;;  %s1058_s30 = smov 8  }
 0x1d2   : > { %945 = dma.vmem_to_hbm [thread:$0]  (%p1122_p5), %s1370_s6, 3072, %s1368_s9, %s1378_s19, %s1057_s29, %s1057_s29, %s1058_s30  }
 0x1d3 PF: > { %p951_p13 = scmp.ge.s32.totalorder %s1051_s18, 2  ;;  %s770_s5 = sand.u32 1, %s1039_s15  }
 0x1d4   : > { %s771_s7 = scalar_lea.sflag [#allocation3], %s770_s5 }
 0x1d5   : > { %p948_p0 = pnand %p951_p13, %p1126_p6 }
 0x1d7   : > { %p949_p1 = pneg %p948_p0 }
 0x1d9   : > { %1034 = dma.done.wait (%p949_p1), %s771_s7, 3072  }
 0x1da   : > { %1036 = vsyncadd (%p949_p1), %s771_s7, 4294964224  ;;  %p14_p2 = scmp.ge.s32.totalorder %s1109_s21, 4   ;;  %s1425_s15 = smov %s1043_s16 }
 0x1db   : > { %s1426_s16 = smov %s1047_s17  ;;  %s1427_s17 = smov %s1120_s24 }
 0x1dc   : > { %s1428_s18 = smov %s1109_s21  ;;  %16 = sbr.rel (!%p14_p2) target bundleno = 3 (0x3), region = 71 }
 0x1e1   :  { %776 = vsyncpa [#allocation3], 1 }
 0x1e2   :  { %778 = vsyncpa [#allocation3 + $0x1], 1 }

</bundles_post_ra>
